<compile_context>
chip_gen: v5e
topology: v5e:2x2
jax: 0.10.0
libtpu: 0.0.40
codegen_flags: <defaults>
</compile_context>

<pallas_src>
import math
from functools import partial

import jax
import jax.numpy as jnp
from jax.experimental import pallas as pl
from jax.experimental.pallas import tpu as pltpu


# ----------------------------------------------------------------------------
# Buffer setup (plain JAX glue) — mirrors PositionalEncoding.__init__
# ----------------------------------------------------------------------------
def make_pe_table(d_model: int, max_len: int = 5000, dtype=jnp.float32):
    position = jnp.arange(max_len, dtype=jnp.float32)[:, None]            # (max_len, 1)
    div_term = jnp.exp(
        jnp.arange(0, d_model, 2, dtype=jnp.float32) * -(math.log(10000.0) / d_model)
    )                                                                      # (d_model//2,)
    ang = position * div_term                                              # (max_len, d_model//2)
    pe = jnp.zeros((max_len, d_model), dtype=jnp.float32)
    pe = pe.at[:, 0::2].set(jnp.sin(ang))
    pe = pe.at[:, 1::2].set(jnp.cos(ang))
    return pe.astype(dtype)                                                # (max_len, d_model)


# ----------------------------------------------------------------------------
# Kernels
# ----------------------------------------------------------------------------
def _add_pe_kernel(x_ref, pe_ref, o_ref):
    # x_ref: (TR, TC) block, pe_ref: (1, TC) block -> broadcast add over rows.
    # pe is pre-cast to x.dtype in the wrapper, so no in-kernel casts.
    o_ref[...] = (x_ref[...] + pe_ref[...]).astype(o_ref.dtype)


def _add_pe_dropout_kernel(x_ref, pe_ref, bits_ref, o_ref, *, threshold, scale):
    # Inverted dropout: keep iff raw uint32 bits >= threshold (P(keep) = 1 - p),
    # scale folded into the select.
    keep = bits_ref[...] >= jnp.uint32(threshold)
    val = x_ref[...] + pe_ref[...]
    o_ref[...] = jnp.where(keep, val * scale, jnp.zeros((), val.dtype)).astype(o_ref.dtype)


# ----------------------------------------------------------------------------
# Tiling heuristic: big, lane-dense blocks that respect the (8, 128) rule
# ----------------------------------------------------------------------------
def _choose_tiles(n_rows: int, n_cols: int, itemsize: int,
                  target_bytes: int = 2 * 1024 * 1024):
    # Column tile: full width if an 8-row block fits the budget, else the
    # largest multiple of 128 lanes that keeps an 8-row block within budget.
    if n_cols * itemsize * 8 <= target_bytes:
        tc = n_cols
    else:
        tc = max(128, (target_bytes // (8 * itemsize)) // 128 * 128)
    # Row tile: as many rows as fit the budget; multiple of 8 unless we take
    # the whole (small) row extent.
    tr = max(1, target_bytes // (tc * itemsize))
    if tr >= n_rows:
        tr = n_rows
    else:
        tr = max(8, (tr // 8) * 8)
    return tr, tc


# ----------------------------------------------------------------------------
# Wrapper (forward pass)
# ----------------------------------------------------------------------------
def positional_encoding_forward(x, pe_table, *, dropout_p: float = 0.1,
                                deterministic: bool = True, rng_key=None):
    orig_shape = x.shape
    if x.ndim == 3:
        B, S, D = x.shape
        N = B
    elif x.ndim == 4:
        B, C, S, D = x.shape
        N = B * C                      # pe broadcasts identically over B and C
    else:
        raise ValueError(f"expected 3-D or 4-D input, got shape {x.shape}")

    assert D == pe_table.shape[1], "d_model mismatch"
    L = S * D

    # Lane-dense slab: one batch element per row, (S*D) along lanes.
    x2 = x.reshape(N, L)
    # Note: adding in x.dtype (pe pre-cast) differs from PyTorch's f32 promotion
    # when x is bf16/fp16; exact for f32 inputs.
    pe2 = pe_table[:S].reshape(1, L).astype(x.dtype)

    itemsize = jnp.dtype(x.dtype).itemsize
    tr, tc = _choose_tiles(N, L, itemsize)
    grid = (pl.cdiv(N, tr), pl.cdiv(L, tc))

    x_spec = pl.BlockSpec((tr, tc), lambda r, c: (r, c))
    pe_spec = pl.BlockSpec((1, tc), lambda r, c: (0, c))
    o_spec = pl.BlockSpec((tr, tc), lambda r, c: (r, c))
    cparams = pltpu.CompilerParams(
        dimension_semantics=("parallel", "parallel"),
        vmem_limit_bytes=48 * 1024 * 1024,
    )
    out_shape = jax.ShapeDtypeStruct((N, L), x.dtype)

    if deterministic or dropout_p == 0.0:
        out2 = pl.pallas_call(
            _add_pe_kernel,
            out_shape=out_shape,
            grid_spec=pltpu.PrefetchScalarGridSpec(
                num_scalar_prefetch=0,
                grid=grid,
                in_specs=[x_spec, pe_spec],
                out_specs=o_spec,
            ),
            compiler_params=cparams,
        )(x2, pe2)
    else:
        if rng_key is None:
            rng_key = jax.random.PRNGKey(0)
        bits = jax.random.bits(rng_key, (N, L), dtype=jnp.uint32)
        threshold = min(int(round(float(dropout_p) * float(2 ** 32))), 2 ** 32 - 1)
        scale = 1.0 / (1.0 - float(dropout_p))
        bits_spec = pl.BlockSpec((tr, tc), lambda r, c: (r, c))
        out2 = pl.pallas_call(
            partial(_add_pe_dropout_kernel, threshold=threshold, scale=scale),
            out_shape=out_shape,
            grid_spec=pltpu.PrefetchScalarGridSpec(
                num_scalar_prefetch=0,
                grid=grid,
                in_specs=[x_spec, pe_spec, bits_spec],
                out_specs=o_spec,
            ),
            compiler_params=cparams,
        )(x2, pe2, bits)

    return out2.reshape(orig_shape)


# ----------------------------------------------------------------------------
# Main
# ----------------------------------------------------------------------------
if __name__ == "__main__":
    d_model = 32
    max_len = 64
    seq = 8
    batch = 2
    channels = 4

    key = jax.random.PRNGKey(0)
    k3, k4, kd = jax.random.split(key, 3)

    pe_table = make_pe_table(d_model, max_len=max_len)

    # --- 3-D path: x of shape (B, S, D) ---
    x3 = jax.random.normal(k3, (batch, seq, d_model), dtype=jnp.float32)
    y3 = jax.block_until_ready(
        positional_encoding_forward(x3, pe_table, deterministic=True))
    ref3 = x3 + pe_table[None, :seq, :]
    assert y3.shape == x3.shape
    assert jnp.allclose(y3, ref3, atol=1e-6), "3-D path mismatch"

    # --- 4-D path: x of shape (B, C, S, D) ---
    x4 = jax.random.normal(k4, (batch, channels, seq, d_model), dtype=jnp.float32)
    y4 = jax.block_until_ready(
        positional_encoding_forward(x4, pe_table, deterministic=True))
    ref4 = x4 + pe_table[None, None, :seq, :]
    assert y4.shape == x4.shape
    assert jnp.allclose(y4, ref4, atol=1e-6), "4-D path mismatch"

    # --- training-mode dropout path ---
    p = 0.1
    yd = jax.block_until_ready(
        positional_encoding_forward(x3, pe_table, dropout_p=p,
                                    deterministic=False, rng_key=kd))
    assert yd.shape == x3.shape
    # Kept elements must equal (x + pe) * 1/(1-p); dropped elements are 0.
    ref_scaled = ref3 * (1.0 / (1.0 - p))
    kept = yd != 0.0
    assert jnp.allclose(jnp.where(kept, yd, 0.0),
                        jnp.where(kept, ref_scaled, 0.0), atol=1e-5), \
        "dropout path mismatch"

    print("KERNEL_OK")
</pallas_src>

<mosaic_0001>
module attributes {stable_mosaic.version = 11 : i64} {
  func.func @_add_pe_kernel(%arg0: i32, %arg1: i32, %arg2: memref<2x256xf32, #tpu.memory_space<vmem>>, %arg3: memref<1x256xf32, #tpu.memory_space<vmem>>, %arg4: memref<2x256xf32, #tpu.memory_space<vmem>>) attributes {dimension_semantics = [#tpu.dimension_semantics<parallel>, #tpu.dimension_semantics<parallel>], iteration_bounds = array<i64: 1, 1>, scalar_prefetch = 0 : i64, scratch_operands = 0 : i64, tpu.core_type = #tpu.core_type<tc>, window_params = [{transform_indices = @transform_0, window_bounds = array<i64: 2, 256>}, {transform_indices = @transform_1, window_bounds = array<i64: 1, 256>}, {transform_indices = @transform_2, window_bounds = array<i64: 2, 256>}]} {
    %c0 = arith.constant 0 : index
    %c0_0 = arith.constant 0 : index
    %0 = vector.load %arg2[%c0, %c0_0] : memref<2x256xf32, #tpu.memory_space<vmem>>, vector<2x256xf32>
    %c0_1 = arith.constant 0 : index
    %c0_2 = arith.constant 0 : index
    %1 = vector.load %arg3[%c0_1, %c0_2] : memref<1x256xf32, #tpu.memory_space<vmem>>, vector<1x256xf32>
    %2 = vector.broadcast %1 : vector<1x256xf32> to vector<2x256xf32>
    %3 = arith.addf %0, %2 : vector<2x256xf32>
    %c0_3 = arith.constant 0 : index
    %c0_4 = arith.constant 0 : index
    %4 = vector.load %arg4[%c0_3, %c0_4] : memref<2x256xf32, #tpu.memory_space<vmem>>, vector<2x256xf32>
    tpu.vector_store %arg4[%c0_3, %c0_4], %3 {strides = array<i32>} : memref<2x256xf32, #tpu.memory_space<vmem>>, vector<2x256xf32>,
    return
  }
  func.func @transform_0(%arg0: i32, %arg1: i32) -> (i32, i32) {
    %c0_i32 = arith.constant 0 : i32
    return %arg0, %arg1 : i32, i32
  }
  func.func @transform_1(%arg0: i32, %arg1: i32) -> (i32, i32) {
    %c0_i32 = arith.constant 0 : i32
    %c0_i32_0 = arith.constant 0 : i32
    return %c0_i32, %arg1 : i32, i32
  }
  func.func @transform_2(%arg0: i32, %arg1: i32) -> (i32, i32) {
    %c0_i32 = arith.constant 0 : i32
    return %arg0, %arg1 : i32, i32
  }
}

</mosaic_0001>

<bundles_post_ra>
// kernel: tpu_custom_call.1
= control target key start
LH: loop header
LB: loop body
LE: loop exit
PB: predicated region body
PF: predicated region fallthrough
CT: control target
= control target key end

     0   :  { %7 = vsyncpa [#allocation3], 0  ;;  %s177_s0 = inlined_call_operand.hbm [shape: f32[2,256], index: 0, kind: input, shape index: {}]   ;;  %s178_s1 = inlined_call_operand.hbm [shape: f32[1,256], index: 1, kind: input, shape index: {}]   ;;  %s179_s2 = inlined_call_operand.hbm [shape: f32[2,256], index: 2, kind: output, shape index: {}]  }
   0x1   :  { %8 = vsyncpa [#allocation6], 0 }
   0x2   :  { %9 = vsyncpa [#allocation4], 0  ;;  %s15_s11 = sshll.u32 %s177_s0, 4  ;;  %s150_s12 = smov [#allocation2]   ;;  %s16_s11 = int_to_ptr.hbm [resolvable:$true] %s15_s11 }
   0x3   :  { %s17_s13 = sshll.u32 %s150_s12, 4  ;;  %s26_s16 = sshll.u32 %s178_s1, 4  ;;  %s18_s13 = int_to_ptr.vmem [resolvable:$true] %s17_s13  ;;  %s27_s16 = int_to_ptr.hbm [resolvable:$true] %s26_s16 }
   0x4   :  { %20 = dma.hbm_to_vmem [thread:$0]  %s16_s11, 64, %s18_s13, [#allocation3]  }
   0x5   :  { %s151_s17 = smov [#allocation5]  }
   0x6   :  { %s28_s18 = sshll.u32 %s151_s17, 4  ;;  %s29_s18 = int_to_ptr.vmem [resolvable:$true] %s28_s18 }
   0x7   :  { %31 = dma.hbm_to_vmem [thread:$0]  %s27_s16, 32, %s29_s18, [#allocation6]  }
   0x8   :  { %144 = dma.done.wait [#allocation3], 64  }
   0x9   :  { %145 = vsyncadd [#allocation3], 4294967232 }
   0xa   :  { %146 = dma.done.wait [#allocation6], 32  }
   0xb   :  { %147 = vsyncadd [#allocation6], 4294967264  ;;  %v41_v0 = vld [vmem:[#allocation5] sm:$0x3]  ;;  %vm46_vm0 = vcmask 1041408   ;;  %s152_s0 = smov [#allocation7]  }
   0xc   :  { %v43_v1 = vperm.slane %v41_v0, 0  ;;  %v44_v2 = vperm.slane %v41_v0, 1  ;;  %v40_v3 = vld [vmem:[#allocation2] sm:$0xf]  ;;  %s56_s19 = sshll.u32 %s152_s0, 4  ;;  %s58_s21 = sshll.u32 %s179_s2, 4  ;;  %s57_s19 = int_to_ptr.vmem [resolvable:$true] %s56_s19  ;;  %s59_s21 = int_to_ptr.hbm [resolvable:$true] %s58_s21 }
   0xe   :  { %v45_v4 = vrot.slane %v44_v2, 6 }
  0x10   :  { %v47_v5 = vsel %vm46_vm0, %v43_v1, %v45_v4 }
  0x11   :  { %v49_v6 = vadd.f32 %v47_v5, %v40_v3 }
  0x13   :  { %50 = vst [vmem:[#allocation7] sm:$0xf] %v49_v6 }
  0x14   :  { %61 = dma.vmem_to_hbm [thread:$0]  %s57_s19, 64, %s59_s21, [#allocation4]  }
  0x15   :  { %148 = dma.done.wait [#allocation4], 64  }
  0x16   :  { %149 = vsyncadd [#allocation4], 4294967232 }
  0x17   :  { %66 = vsyncpa [#allocation3], 1 }
  0x18   :  { %67 = vsyncpa [#allocation6], 1 }
  0x19   :  { %68 = vsyncpa [#allocation4], 1 }

</bundles_post_ra>
